<compile_context>
chip_gen: v6e
topology: v6e:2x2x1
jax: 0.10.0
libtpu: 0.0.40
codegen_flags: <defaults>
</compile_context>

<pallas_src>
import functools
import math

import jax
import jax.numpy as jnp
from jax import lax
from jax.experimental import pallas as pl
from jax.experimental.pallas import tpu as pltpu


def _cross_attn_kernel(x1_ref, x2_ref, wq_ref, wk_ref, wv_ref, wo_ref, bo_ref,
                       o_ref, k_scr, v_scr, *, num_heads, k_dim, v_dim):
    """One grid step: one (1, block_l1) tile of x1 against the full L2 of x2.

    grid = (B, L1 // block_l1); axis 0 = batch ("parallel"), axis 1 = L1 tiles
    ("arbitrary") so the per-batch K/V scratch written at program_id(1) == 0
    remains valid for the remaining L1 tiles of the same batch element.
    """
    _, L1t, D1 = x1_ref.shape
    _, L2, D2 = x2_ref.shape
    H, K, V = num_heads, k_dim, v_dim
    cdt = wq_ref.dtype                      # MXU compute dtype (bf16 by default)

    # ---- K/V projections: one fused GEMM each, only once per batch element
    # (x2 is invariant along the L1 grid axis).  Results are relaid out
    # head-major into persistent VMEM scratch so the attention dots below are
    # single head-batched dot_generals with no per-step relayout of K/V.
    @pl.when(pl.program_id(1) == 0)
    def _project_kv():
        x2 = x2_ref[...].reshape(L2, D2).astype(cdt)
        k = jnp.dot(x2, wk_ref[...], preferred_element_type=jnp.float32)   # (L2, H*K)
        v = jnp.dot(x2, wv_ref[...], preferred_element_type=jnp.float32)   # (L2, H*V)
        for h in range(H):                  # static unroll; amortized over L1 tiles
            k_scr[h] = k[:, h * K:(h + 1) * K].astype(cdt)
            v_scr[h] = v[:, h * V:(h + 1) * V].astype(cdt)

    # ---- Q projection: one fused GEMM (output width H*K).  The 1/sqrt(k_dim)
    # scale is pre-folded into wq by the wrapper, so no per-step multiply.
    x1 = x1_ref[...].reshape(L1t, D1).astype(cdt)
    q = jnp.dot(x1, wq_ref[...], preferred_element_type=jnp.float32)       # (L1t, H*K)
    # Head-major relayout: static lane slices of the GEMM output, stacked on a
    # new leading (head) axis — stays in vregs, no VMEM round trip.
    q_hm = jnp.stack([q[:, h * K:(h + 1) * K] for h in range(H)],
                     axis=0).astype(cdt)                                   # (H, L1t, K)

    # ---- Scores / softmax / PV with heads folded into the dot_general batch
    # dim: one batched matmul each instead of H small ones.
    k_hm = k_scr[...]                                                      # (H, L2, K)
    v_hm = v_scr[...]                                                      # (H, L2, V)
    s = lax.dot_general(q_hm, k_hm, (((2,), (2,)), ((0,), (0,))),
                        preferred_element_type=jnp.float32)                # (H, L1t, L2)
    # TODO(synk): optional `mask` argument of the PyTorch module not
    # implemented (default mask=None path); would be jnp.where(mask == 0,
    # -1e9, s) on the score tile here.
    s = s - jnp.max(s, axis=-1, keepdims=True)
    p = jnp.exp(s)
    p = p * pl.reciprocal(jnp.sum(p, axis=-1, keepdims=True), approx=True)
    o = lax.dot_general(p.astype(cdt), v_hm, (((2,), (1,)), ((0,), (0,))),
                        preferred_element_type=jnp.float32)                # (H, L1t, V)

    # ---- Output projection: head-batched dot with full-width (D1) lanes,
    # reduced over heads in vregs — no VMEM accumulator RMW, single store.
    y = lax.dot_general(o.astype(cdt), wo_ref[...],
                        (((2,), (1,)), ((0,), (0,))),
                        preferred_element_type=jnp.float32)                # (H, L1t, D1)
    y = jnp.sum(y, axis=0) + bo_ref[...]                                   # (L1t, D1) + (1, D1)
    o_ref[...] = y.reshape(1, L1t, D1).astype(o_ref.dtype)

    # TODO(synk): for very long L2 (esp. v7x's 64 MiB VMEM) add a KV grid axis
    # with flash-style online-softmax accumulators and -inf masking of padded
    # KV columns, and single-buffer the constant-index weight specs
    # (pipeline_mode=pl.Buffered(1)) to cut their second pipeline buffer.


def cross_attention(x1, x2, params, *, num_heads, k_dim, v_dim,
                    block_l1=None, compute_dtype=jnp.bfloat16):
    """x1: (B, L1, D1), x2: (B, L2, D2) -> (B, L1, D1).

    params = (wq, wk, wv, wo, bo) with torch.nn.Linear weights pre-transposed
    to (in_features, out_features):
      wq (D1, H*K), wk (D2, H*K), wv (D2, H*V), wo (H*V, D1), bo (1, D1).

    MXU operands use `compute_dtype` (bf16 by default) with f32 accumulation;
    pass compute_dtype=jnp.float32 for exact-f32 matmuls.
    """
    B, L1, D1 = x1.shape
    _, L2, D2 = x2.shape
    wq, wk, wv, wo, bo = params
    H = num_heads

    if block_l1 is None:
        # ~256 activation rows/step amortizes the ~0.35us grid-step overhead
        # and better fills the 256-wide MXU on v6e/v7x (re-derive on v7x if
        # the full-L2 score tile presses the 64 MiB VMEM).
        block_l1 = min(L1, 256)
    assert L1 % block_l1 == 0, "L1 must be divisible by block_l1"

    scale = 1.0 / math.sqrt(k_dim)
    # Fold the score scale into Wq (done once, before the cast) and pre-cast
    # all projection weights to the MXU compute dtype.
    wq_c = (wq * scale).astype(compute_dtype)
    wk_c = wk.astype(compute_dtype)
    wv_c = wv.astype(compute_dtype)
    wo_hm = wo.reshape(H, v_dim, D1).astype(compute_dtype)   # head-major rows
    bo_c = bo.astype(jnp.float32)

    kernel = functools.partial(_cross_attn_kernel,
                               num_heads=H, k_dim=k_dim, v_dim=v_dim)

    def const(shape):
        # Constant block index -> fetched once, resident across grid steps.
        return pl.BlockSpec(shape, lambda b, i, _s=shape: (0,) * len(_s))

    grid = (B, L1 // block_l1)

    return pl.pallas_call(
        kernel,
        out_shape=jax.ShapeDtypeStruct((B, L1, D1), x1.dtype),
        grid_spec=pltpu.PrefetchScalarGridSpec(
            num_scalar_prefetch=0,
            grid=grid,
            in_specs=[
                pl.BlockSpec((1, block_l1, D1), lambda b, i: (b, i, 0)),  # x1 tile
                pl.BlockSpec((1, L2, D2),       lambda b, i: (b, 0, 0)),  # x2 (per batch elem)
                const((D1, H * k_dim)),                                   # Wq (scale folded)
                const((D2, H * k_dim)),                                   # Wk (fused)
                const((D2, H * v_dim)),                                   # Wv (fused)
                const((H, v_dim, D1)),                                    # Wo (head-major)
                const((1, D1)),                                           # bias
            ],
            out_specs=pl.BlockSpec((1, block_l1, D1), lambda b, i: (b, i, 0)),
            scratch_shapes=[
                pltpu.VMEM((H, L2, k_dim), compute_dtype),   # K cache (head-major)
                pltpu.VMEM((H, L2, v_dim), compute_dtype),   # V cache (head-major)
            ],
        ),
        compiler_params=pltpu.CompilerParams(
            # Batch axis feeds both cores; L1 axis must be "arbitrary" so the
            # per-batch K/V scratch written at i == 0 is valid for i > 0.
            dimension_semantics=("parallel", "arbitrary"),
            vmem_limit_bytes=48 * 1024 * 1024),
    )(x1, x2, wq_c, wk_c, wv_c, wo_hm, bo_c)


def reference(x1, x2, params, *, num_heads, k_dim, v_dim):
    """Pure-JAX f32 reference mirroring the PyTorch forward."""
    wq, wk, wv, wo, bo = params
    B, L1, D1 = x1.shape
    L2 = x2.shape[1]
    q = (x1 @ wq).reshape(B, L1, num_heads, k_dim).transpose(0, 2, 1, 3)
    k = (x2 @ wk).reshape(B, L2, num_heads, k_dim).transpose(0, 2, 3, 1)
    v = (x2 @ wv).reshape(B, L2, num_heads, v_dim).transpose(0, 2, 1, 3)
    attn = (q @ k) / math.sqrt(k_dim)
    attn = jax.nn.softmax(attn, axis=-1)
    out = (attn @ v).transpose(0, 2, 1, 3).reshape(B, L1, num_heads * v_dim)
    return out @ wo + bo


if __name__ == "__main__":
    # Small shapes consistent with the module's forward.
    B, L1, L2 = 2, 8, 8
    in_dim1, in_dim2 = 32, 32
    k_dim, v_dim, num_heads = 16, 16, 2

    key = jax.random.PRNGKey(0)
    ks = jax.random.split(key, 7)
    x1 = jax.random.normal(ks[0], (B, L1, in_dim1), jnp.float32)
    x2 = jax.random.normal(ks[1], (B, L2, in_dim2), jnp.float32)

    # Deterministic parameter init (weights stored transposed: (in, out)).
    wq = jax.random.normal(ks[2], (in_dim1, k_dim * num_heads), jnp.float32) * 0.1
    wk = jax.random.normal(ks[3], (in_dim2, k_dim * num_heads), jnp.float32) * 0.1
    wv = jax.random.normal(ks[4], (in_dim2, v_dim * num_heads), jnp.float32) * 0.1
    wo = jax.random.normal(ks[5], (v_dim * num_heads, in_dim1), jnp.float32) * 0.1
    bo = jax.random.normal(ks[6], (1, in_dim1), jnp.float32) * 0.1
    params = (wq, wk, wv, wo, bo)

    ref = reference(x1, x2, params,
                    num_heads=num_heads, k_dim=k_dim, v_dim=v_dim)

    # Default path: bf16 MXU operands, f32 accumulation.
    out = cross_attention(x1, x2, params,
                          num_heads=num_heads, k_dim=k_dim, v_dim=v_dim)
    out = jax.block_until_ready(out)
    assert out.shape == (B, L1, in_dim1)
    # Tolerance covers bf16 operands + the EUP approx-reciprocal softmax denom.
    assert jnp.allclose(out, ref, atol=2.5e-2, rtol=2.5e-2), "bf16 path mismatch"

    # Exact-f32 path for a tighter parity check.
    out_f32 = cross_attention(x1, x2, params,
                              num_heads=num_heads, k_dim=k_dim, v_dim=v_dim,
                              compute_dtype=jnp.float32)
    out_f32 = jax.block_until_ready(out_f32)
    assert jnp.allclose(out_f32, ref, atol=1e-2, rtol=1e-2), "f32 path mismatch"

    print("KERNEL_OK")
</pallas_src>

<mosaic_0001>
module attributes {stable_mosaic.version = 11 : i64} {
  func.func @_cross_attn_kernel(%arg0: i32, %arg1: i32, %arg2: memref<1x8x32xf32, #tpu.memory_space<vmem>>, %arg3: memref<1x8x32xf32, #tpu.memory_space<vmem>>, %arg4: memref<32x32xbf16, #tpu.memory_space<vmem>>, %arg5: memref<32x32xbf16, #tpu.memory_space<vmem>>, %arg6: memref<32x32xbf16, #tpu.memory_space<vmem>>, %arg7: memref<2x16x32xbf16, #tpu.memory_space<vmem>>, %arg8: memref<1x32xf32, #tpu.memory_space<vmem>>, %arg9: memref<1x8x32xf32, #tpu.memory_space<vmem>>, %arg10: memref<2x8x16xbf16, #tpu.memory_space<vmem>>, %arg11: memref<2x8x16xbf16, #tpu.memory_space<vmem>>) attributes {dimension_semantics = [#tpu.dimension_semantics<parallel>, #tpu.dimension_semantics<arbitrary>], iteration_bounds = array<i64: 2, 1>, scalar_prefetch = 0 : i64, scratch_operands = 2 : i64, tpu.core_type = #tpu.core_type<tc>, window_params = [{transform_indices = @transform_0, window_bounds = array<i64: 1, 8, 32>}, {transform_indices = @transform_1, window_bounds = array<i64: 1, 8, 32>}, {pipeline_mode = #tpu.pipeline_mode<synchronous>, transform_indices = @transform_2, window_bounds = array<i64: 32, 32>}, {pipeline_mode = #tpu.pipeline_mode<synchronous>, transform_indices = @transform_3, window_bounds = array<i64: 32, 32>}, {pipeline_mode = #tpu.pipeline_mode<synchronous>, transform_indices = @transform_4, window_bounds = array<i64: 32, 32>}, {pipeline_mode = #tpu.pipeline_mode<synchronous>, transform_indices = @transform_5, window_bounds = array<i64: 2, 16, 32>}, {pipeline_mode = #tpu.pipeline_mode<synchronous>, transform_indices = @transform_6, window_bounds = array<i64: 1, 32>}, {transform_indices = @transform_7, window_bounds = array<i64: 1, 8, 32>}]} {
    %c0_i32 = arith.constant 0 : i32
    %0 = arith.cmpi eq, %arg1, %c0_i32 : i32
    %1 = arith.extui %0 : i1 to i32
    %c0_i32_0 = arith.constant 0 : i32
    %2 = arith.cmpi ne, %1, %c0_i32_0 : i32
    scf.if %2 {
      %c0_25 = arith.constant 0 : index
      %c0_26 = arith.constant 0 : index
      %c0_27 = arith.constant 0 : index
      %38 = vector.load %arg3[%c0_25, %c0_26, %c0_27] : memref<1x8x32xf32, #tpu.memory_space<vmem>>, vector<1x8x32xf32>
      %39 = vector.shape_cast %38 : vector<1x8x32xf32> to vector<8x32xf32>
      %40 = arith.truncf %39 : vector<8x32xf32> to vector<8x32xbf16>
      %c0_28 = arith.constant 0 : index
      %c0_29 = arith.constant 0 : index
      %41 = vector.load %arg5[%c0_28, %c0_29] : memref<32x32xbf16, #tpu.memory_space<vmem>>, vector<32x32xbf16>
      %cst_30 = arith.constant dense<0.000000e+00> : vector<8x32xf32>
      %42 = tpu.matmul %40, %41, %cst_30 {dimension_numbers = #tpu.dot_dimension_numbers<[1], [0], [0], [1], [0, 0, 1, 1], [], []>} : vector<8x32xbf16>, vector<32x32xbf16>, vector<8x32xf32> -> vector<8x32xf32>
      %c0_31 = arith.constant 0 : index
      %c0_32 = arith.constant 0 : index
      %43 = vector.load %arg6[%c0_31, %c0_32] : memref<32x32xbf16, #tpu.memory_space<vmem>>, vector<32x32xbf16>
      %cst_33 = arith.constant dense<0.000000e+00> : vector<8x32xf32>
      %44 = tpu.matmul %40, %43, %cst_33 {dimension_numbers = #tpu.dot_dimension_numbers<[1], [0], [0], [1], [0, 0, 1, 1], [], []>} : vector<8x32xbf16>, vector<32x32xbf16>, vector<8x32xf32> -> vector<8x32xf32>
      %45 = vector.extract_strided_slice %42 {offsets = [0, 0], sizes = [8, 16], strides = [1, 1]} : vector<8x32xf32> to vector<8x16xf32>
      %46 = arith.truncf %45 : vector<8x16xf32> to vector<8x16xbf16>
      %c0_34 = arith.constant 0 : index
      %c0_35 = arith.constant 0 : index
      %c0_36 = arith.constant 0 : index
      %47 = vector.load %arg10[%c0_34, %c0_35, %c0_36] : memref<2x8x16xbf16, #tpu.memory_space<vmem>>, vector<1x8x16xbf16>
      %48 = vector.shape_cast %47 : vector<1x8x16xbf16> to vector<8x16xbf16>
      %49 = vector.shape_cast %46 : vector<8x16xbf16> to vector<1x8x16xbf16>
      tpu.vector_store %arg10[%c0_34, %c0_35, %c0_36], %49 {strides = array<i32>} : memref<2x8x16xbf16, #tpu.memory_space<vmem>>, vector<1x8x16xbf16>,
      %50 = vector.extract_strided_slice %44 {offsets = [0, 0], sizes = [8, 16], strides = [1, 1]} : vector<8x32xf32> to vector<8x16xf32>
      %51 = arith.truncf %50 : vector<8x16xf32> to vector<8x16xbf16>
      %c0_37 = arith.constant 0 : index
      %c0_38 = arith.constant 0 : index
      %c0_39 = arith.constant 0 : index
      %52 = vector.load %arg11[%c0_37, %c0_38, %c0_39] : memref<2x8x16xbf16, #tpu.memory_space<vmem>>, vector<1x8x16xbf16>
      %53 = vector.shape_cast %52 : vector<1x8x16xbf16> to vector<8x16xbf16>
      %54 = vector.shape_cast %51 : vector<8x16xbf16> to vector<1x8x16xbf16>
      tpu.vector_store %arg11[%c0_37, %c0_38, %c0_39], %54 {strides = array<i32>} : memref<2x8x16xbf16, #tpu.memory_space<vmem>>, vector<1x8x16xbf16>,
      %55 = vector.extract_strided_slice %42 {offsets = [0, 16], sizes = [8, 16], strides = [1, 1]} : vector<8x32xf32> to vector<8x16xf32>
      %56 = arith.truncf %55 : vector<8x16xf32> to vector<8x16xbf16>
      %c1 = arith.constant 1 : index
      %c0_40 = arith.constant 0 : index
      %c0_41 = arith.constant 0 : index
      %57 = vector.load %arg10[%c1, %c0_40, %c0_41] : memref<2x8x16xbf16, #tpu.memory_space<vmem>>, vector<1x8x16xbf16>
      %58 = vector.shape_cast %57 : vector<1x8x16xbf16> to vector<8x16xbf16>
      %59 = vector.shape_cast %56 : vector<8x16xbf16> to vector<1x8x16xbf16>
      tpu.vector_store %arg10[%c1, %c0_40, %c0_41], %59 {strides = array<i32>} : memref<2x8x16xbf16, #tpu.memory_space<vmem>>, vector<1x8x16xbf16>,
      %60 = vector.extract_strided_slice %44 {offsets = [0, 16], sizes = [8, 16], strides = [1, 1]} : vector<8x32xf32> to vector<8x16xf32>
      %61 = arith.truncf %60 : vector<8x16xf32> to vector<8x16xbf16>
      %c1_42 = arith.constant 1 : index
      %c0_43 = arith.constant 0 : index
      %c0_44 = arith.constant 0 : index
      %62 = vector.load %arg11[%c1_42, %c0_43, %c0_44] : memref<2x8x16xbf16, #tpu.memory_space<vmem>>, vector<1x8x16xbf16>
      %63 = vector.shape_cast %62 : vector<1x8x16xbf16> to vector<8x16xbf16>
      %64 = vector.shape_cast %61 : vector<8x16xbf16> to vector<1x8x16xbf16>
      tpu.vector_store %arg11[%c1_42, %c0_43, %c0_44], %64 {strides = array<i32>} : memref<2x8x16xbf16, #tpu.memory_space<vmem>>, vector<1x8x16xbf16>,
    } else {
    }
    %c0 = arith.constant 0 : index
    %c0_1 = arith.constant 0 : index
    %c0_2 = arith.constant 0 : index
    %3 = vector.load %arg2[%c0, %c0_1, %c0_2] : memref<1x8x32xf32, #tpu.memory_space<vmem>>, vector<1x8x32xf32>
    %4 = vector.shape_cast %3 : vector<1x8x32xf32> to vector<8x32xf32>
    %5 = arith.truncf %4 : vector<8x32xf32> to vector<8x32xbf16>
    %c0_3 = arith.constant 0 : index
    %c0_4 = arith.constant 0 : index
    %6 = vector.load %arg4[%c0_3, %c0_4] : memref<32x32xbf16, #tpu.memory_space<vmem>>, vector<32x32xbf16>
    %cst = arith.constant dense<0.000000e+00> : vector<8x32xf32>
    %7 = tpu.matmul %5, %6, %cst {dimension_numbers = #tpu.dot_dimension_numbers<[1], [0], [0], [1], [0, 0, 1, 1], [], []>} : vector<8x32xbf16>, vector<32x32xbf16>, vector<8x32xf32> -> vector<8x32xf32>
    %8 = vector.extract_strided_slice %7 {offsets = [0, 0], sizes = [8, 16], strides = [1, 1]} : vector<8x32xf32> to vector<8x16xf32>
    %9 = vector.extract_strided_slice %7 {offsets = [0, 16], sizes = [8, 16], strides = [1, 1]} : vector<8x32xf32> to vector<8x16xf32>
    %10 = vector.shape_cast %8 : vector<8x16xf32> to vector<1x8x16xf32>
    %11 = vector.shape_cast %9 : vector<8x16xf32> to vector<1x8x16xf32>
    %12 = tpu.concatenate %10, %11 in 0 : vector<1x8x16xf32>, vector<1x8x16xf32> -> vector<2x8x16xf32>
    %13 = arith.truncf %12 : vector<2x8x16xf32> to vector<2x8x16xbf16>
    %c0_5 = arith.constant 0 : index
    %c0_6 = arith.constant 0 : index
    %c0_7 = arith.constant 0 : index
    %14 = vector.load %arg10[%c0_5, %c0_6, %c0_7] : memref<2x8x16xbf16, #tpu.memory_space<vmem>>, vector<2x8x16xbf16>
    %c0_8 = arith.constant 0 : index
    %c0_9 = arith.constant 0 : index
    %c0_10 = arith.constant 0 : index
    %15 = vector.load %arg11[%c0_8, %c0_9, %c0_10] : memref<2x8x16xbf16, #tpu.memory_space<vmem>>, vector<2x8x16xbf16>
    %cst_11 = arith.constant dense<0.000000e+00> : vector<2x8x8xf32>
    %16 = tpu.matmul %13, %14, %cst_11 {dimension_numbers = #tpu.dot_dimension_numbers<[2], [2], [1], [1], [0, 0, 0, 1, 1, 1], [0], [0]>} : vector<2x8x16xbf16>, vector<2x8x16xbf16>, vector<2x8x8xf32> -> vector<2x8x8xf32>
    %cst_12 = arith.constant dense<0xFF800000> : vector<2x8xf32>
    %17 = vector.multi_reduction <maximumf>, %16, %cst_12 [2] : vector<2x8x8xf32> to vector<2x8xf32>
    %18 = vector.shape_cast %17 : vector<2x8xf32> to vector<2x8x1xf32>
    %19 = vector.broadcast %18 : vector<2x8x1xf32> to vector<2x8x8xf32>
    %20 = arith.subf %16, %19 : vector<2x8x8xf32>
    %21 = math.exp %20 : vector<2x8x8xf32>
    %cst_13 = arith.constant dense<0.000000e+00> : vector<2x8xf32>
    %22 = vector.multi_reduction <add>, %21, %cst_13 [2] : vector<2x8x8xf32> to vector<2x8xf32>
    %23 = vector.shape_cast %22 : vector<2x8xf32> to vector<2x8x1xf32>
    %24 = tpu.reciprocal %23 {approx = true} : vector<2x8x1xf32> -> vector<2x8x1xf32>
    %25 = vector.broadcast %24 : vector<2x8x1xf32> to vector<2x8x8xf32>
    %26 = arith.mulf %21, %25 : vector<2x8x8xf32>
    %27 = arith.truncf %26 : vector<2x8x8xf32> to vector<2x8x8xbf16>
    %cst_14 = arith.constant dense<0.000000e+00> : vector<2x8x16xf32>
    %28 = tpu.matmul %27, %15, %cst_14 {dimension_numbers = #tpu.dot_dimension_numbers<[2], [1], [1], [2], [0, 0, 0, 1, 1, 2], [0], [0]>} : vector<2x8x8xbf16>, vector<2x8x16xbf16>, vector<2x8x16xf32> -> vector<2x8x16xf32>
    %29 = arith.truncf %28 : vector<2x8x16xf32> to vector<2x8x16xbf16>
    %c0_15 = arith.constant 0 : index
    %c0_16 = arith.constant 0 : index
    %c0_17 = arith.constant 0 : index
    %30 = vector.load %arg7[%c0_15, %c0_16, %c0_17] : memref<2x16x32xbf16, #tpu.memory_space<vmem>>, vector<2x16x32xbf16>
    %cst_18 = arith.constant dense<0.000000e+00> : vector<2x8x32xf32>
    %31 = tpu.matmul %29, %30, %cst_18 {dimension_numbers = #tpu.dot_dimension_numbers<[2], [1], [1], [2], [0, 0, 0, 1, 1, 2], [0], [0]>} : vector<2x8x16xbf16>, vector<2x16x32xbf16>, vector<2x8x32xf32> -> vector<2x8x32xf32>
    %cst_19 = arith.constant dense<0.000000e+00> : vector<8x32xf32>
    %32 = vector.multi_reduction <add>, %31, %cst_19 [0] : vector<2x8x32xf32> to vector<8x32xf32>
    %c0_20 = arith.constant 0 : index
    %c0_21 = arith.constant 0 : index
    %33 = vector.load %arg8[%c0_20, %c0_21] : memref<1x32xf32, #tpu.memory_space<vmem>>, vector<1x32xf32>
    %34 = vector.broadcast %33 : vector<1x32xf32> to vector<8x32xf32>
    %35 = arith.addf %32, %34 : vector<8x32xf32>
    %36 = vector.shape_cast %35 : vector<8x32xf32> to vector<1x8x32xf32>
    %c0_22 = arith.constant 0 : index
    %c0_23 = arith.constant 0 : index
    %c0_24 = arith.constant 0 : index
    %37 = vector.load %arg9[%c0_22, %c0_23, %c0_24] : memref<1x8x32xf32, #tpu.memory_space<vmem>>, vector<1x8x32xf32>
    tpu.vector_store %arg9[%c0_22, %c0_23, %c0_24], %36 {strides = array<i32>} : memref<1x8x32xf32, #tpu.memory_space<vmem>>, vector<1x8x32xf32>,
    return
  }
  func.func @transform_0(%arg0: i32, %arg1: i32) -> (i32, i32, i32) {
    %c0_i32 = arith.constant 0 : i32
    %c0_i32_0 = arith.constant 0 : i32
    return %arg0, %arg1, %c0_i32 : i32, i32, i32
  }
  func.func @transform_1(%arg0: i32, %arg1: i32) -> (i32, i32, i32) {
    %c0_i32 = arith.constant 0 : i32
    %c0_i32_0 = arith.constant 0 : i32
    %c0_i32_1 = arith.constant 0 : i32
    return %arg0, %c0_i32, %c0_i32_0 : i32, i32, i32
  }
  func.func @transform_2(%arg0: i32, %arg1: i32) -> (i32, i32) {
    %c0_i32 = arith.constant 0 : i32
    %c0_i32_0 = arith.constant 0 : i32
    %c0_i32_1 = arith.constant 0 : i32
    return %c0_i32, %c0_i32_0 : i32, i32
  }
  func.func @transform_3(%arg0: i32, %arg1: i32) -> (i32, i32) {
    %c0_i32 = arith.constant 0 : i32
    %c0_i32_0 = arith.constant 0 : i32
    %c0_i32_1 = arith.constant 0 : i32
    return %c0_i32, %c0_i32_0 : i32, i32
  }
  func.func @transform_4(%arg0: i32, %arg1: i32) -> (i32, i32) {
    %c0_i32 = arith.constant 0 : i32
    %c0_i32_0 = arith.constant 0 : i32
    %c0_i32_1 = arith.constant 0 : i32
    return %c0_i32, %c0_i32_0 : i32, i32
  }
  func.func @transform_5(%arg0: i32, %arg1: i32) -> (i32, i32, i32) {
    %c0_i32 = arith.constant 0 : i32
    %c0_i32_0 = arith.constant 0 : i32
    %c0_i32_1 = arith.constant 0 : i32
    %c0_i32_2 = arith.constant 0 : i32
    return %c0_i32, %c0_i32_0, %c0_i32_1 : i32, i32, i32
  }
  func.func @transform_6(%arg0: i32, %arg1: i32) -> (i32, i32) {
    %c0_i32 = arith.constant 0 : i32
    %c0_i32_0 = arith.constant 0 : i32
    %c0_i32_1 = arith.constant 0 : i32
    return %c0_i32, %c0_i32_0 : i32, i32
  }
  func.func @transform_7(%arg0: i32, %arg1: i32) -> (i32, i32, i32) {
    %c0_i32 = arith.constant 0 : i32
    %c0_i32_0 = arith.constant 0 : i32
    return %arg0, %arg1, %c0_i32 : i32, i32, i32
  }
}

</mosaic_0001>

<bundles_post_ra>
// kernel: tpu_custom_call.1
= control target key start
LH: loop header
LB: loop body
LE: loop exit
PB: predicated region body
PF: predicated region fallthrough
CT: control target
= control target key end

     0   :  { %s1972_s0 = inlined_call_operand.hbm [shape: f32[2,8,32], index: 0, kind: input, shape index: {}]   ;;  %s1973_s1 = inlined_call_operand.hbm [shape: f32[2,8,32], index: 1, kind: input, shape index: {}]   ;;  %s1974_s2 = inlined_call_operand.hbm [shape: bf16[32,32], index: 2, kind: input, shape index: {}]   ;;  %s1975_s3 = inlined_call_operand.hbm [shape: bf16[32,32], index: 3, kind: input, shape index: {}]   ;;  %s1976_s4 = inlined_call_operand.hbm [shape: bf16[32,32], index: 4, kind: input, shape index: {}]   ;;  %s1977_s5 = inlined_call_operand.hbm [shape: bf16[2,16,32], index: 5, kind: input, shape index: {}]   ;;  %s1978_s6 = inlined_call_operand.vmem [shape: f32[1,32], index: 6, kind: input, shape index: {}]   ;;  %s1979_s7 = inlined_call_operand.hbm [shape: f32[2,8,32], index: 7, kind: output, shape index: {}]  }
   0x1   :  { %1981 = sst [smem:[#allocation22_spill]] %s1972_s0 }
   0x2   :  { %1982 = sst [smem:[#allocation23_spill]] %s1974_s2 }
   0x3   :  { %1983 = sst [smem:[#allocation24_spill]] %s1975_s3 }
   0x4   :  { %1984 = sst [smem:[#allocation25_spill]] %s1976_s4 }
   0x5   :  { %1985 = sst [smem:[#allocation26_spill]] %s1977_s5 }
   0x6   :  { %12 = vsyncpa [#allocation5], 0 }
   0x7   :  { %14 = vsyncpa [#allocation5 + $0x1], 0 }
   0x8   :  { %15 = vsyncpa [#allocation8], 0 }
   0x9   :  { %17 = vsyncpa [#allocation8 + $0x1], 0 }
   0xa   :  { %18 = vsyncpa [#allocation11], 0 }
   0xb   :  { %19 = vsyncpa [#allocation14], 0 }
   0xc   :  { %20 = vsyncpa [#allocation6], 0 }
   0xd   :  { %22 = vsyncpa [#allocation6 + $0x1], 0  ;;  %s1671_s24 = smov 0   ;;  %s1673_s25 = smov 0  }
   0xe   :  { %s1675_s26 = smov 0   ;;  %s1677_s27 = smov 0  }
   0xf   :  { %s1679_s28 = smov 0   ;;  %s1681_s29 = smov 0  }
  0x10 LB: > { %s1702_s30 = sadd.s32 4294967295, %s1617_s29   ;;  %p1107_p0 = scmp.ge.s32.totalorder %s1617_s29, 1  ;;  %s1617_s29 = sphi %s1681_s29, %s28_s29   ;;  %s1613_s28 = sphi %s1679_s28, %s2009_s28   ;;  %s1609_s27 = sphi %s1677_s27, %s2008_s27   ;;  %s1605_s26 = sphi %s1675_s26, %s2007_s26   ;;  %s1601_s25 = sphi %s1673_s25, %s2006_s25   ;;  %s1597_s24 = sphi %s1671_s24, %s2005_s24  }
  0x11   : > { %p1980_p1 = scmp.eq.s32.totalorder %s1702_s30, 0  ;;  %p232_p2 = scmp.lt.s32.totalorder %s1617_s29, 3 }
  0x12   : > { %s1619_s9 = smov [#allocation9]   ;;  %s1620_s12 = smov [#allocation10]  }
  0x13   : > { %p1707_p3 = pnand %p1107_p0, %p232_p2  ;;  %s244_s10 = sshll.u32 %s1619_s9, 4  ;;  %s245_s10 = int_to_ptr.vmem [resolvable:$true] %s244_s10 }
  0x14   : > { %s257_s13 = sshll.u32 %s1620_s12, 4  ;;  %s1621_s14 = smov [#allocation12]   ;;  %s258_s13 = int_to_ptr.vmem [resolvable:$true] %s257_s13 }
  0x15   : > { %p1254_p4 = pneg %p1707_p3  ;;  %s270_s15 = sshll.u32 %s1621_s14, 4  ;;  %s271_s15 = int_to_ptr.vmem [resolvable:$true] %s270_s15 }
  0x16   : > { %s1372_s16 = scalar_lea.vmem %s245_s10, 256  ;;  %p1380_p11 = scmp.lt.s32.totalorder %s245_s10, %s245_s10 }
  0x17   : > { %p1716_p6 = pnand %p1254_p4, %p1980_p1  ;;  %p1373_p8 = scmp.ne.s32.totalorder %s245_s10, %s1372_s16 }
  0x18   : > { %p1381_p12 = scmp.lt.s32.totalorder %s1372_s16, %s1372_s16 }
  0x19   : > { %p1363_p7 = pneg %p1716_p6 }
  0x1a   : > { %p1382_p13 = por %p1381_p12, %p1380_p11 }
  0x1b   : > { %p1375_p9 = pnand %p1373_p8, %p1363_p7 }
  0x1d   : > { %p1376_p10 = pneg %p1375_p9 }
  0x1f   : > { %p1383_p0 = pnand %p1382_p13, %p1376_p10 }
  0x21   : > { %1386 = shalt.err (!%p1383_p0)
}
  0x22   : > { %s1622_s17 = smov 64   ;;  %s1623_s18 = smov 4  }
  0x23   : > { %s1988_s2 = sld [smem:[#allocation23_spill]]  ;;  %s1398_s21 = scalar_lea.vmem %s258_s13, 256 }
  0x24   : > { %p1399_p2 = scmp.ne.s32.totalorder %s258_s13, %s1398_s21  ;;  %p1406_p9 = scmp.lt.s32.totalorder %s258_s13, %s258_s13 }
  0x25   : > { %p1407_p10 = scmp.lt.s32.totalorder %s1398_s21, %s1398_s21 }
  0x26   : > { %p1401_p4 = pnand %p1399_p2, %p1363_p7 }
  0x27   : > { %p1408_p11 = por %p1407_p10, %p1406_p9 }
  0x28   : > { %p1402_p8 = pneg %p1401_p4 }
  0x29   : > { %1257 = dma.hbm_to_vmem [thread:$0]  (!%p1716_p6), %s1988_s2, 256, %s245_s10, [#allocation8], %s1622_s17, %s1622_s17, %s1623_s18  }
  0x2a   : > { %p1409_p12 = pnand %p1408_p11, %p1402_p8 }
  0x2c   : > { %1412 = shalt.err (!%p1409_p12)
}
  0x2d   : > { %s1989_s3 = sld [smem:[#allocation24_spill]]  ;;  %s1424_s9 = scalar_lea.vmem %s271_s15, 256 }
  0x2e   : > { %p1425_p13 = scmp.ne.s32.totalorder %s271_s15, %s1424_s9  ;;  %p1432_p4 = scmp.lt.s32.totalorder %s271_s15, %s271_s15 }
  0x2f   : > { %p1433_p8 = scmp.lt.s32.totalorder %s1424_s9, %s1424_s9 }
  0x30   : > { %p1427_p0 = pnand %p1425_p13, %p1363_p7 }
  0x31   : > { %p1434_p9 = por %p1433_p8, %p1432_p4 }
  0x32   : > { %p1428_p2 = pneg %p1427_p0 }
  0x33   : > { %1260 = dma.hbm_to_vmem [thread:$0]  (!%p1716_p6), %s1989_s3, 256, %s258_s13, [#allocation11], %s1622_s17, %s1622_s17, %s1623_s18  }
  0x34   : > { %p1435_p10 = pnand %p1434_p9, %p1428_p2 }
  0x36   : > { %1438 = shalt.err (!%p1435_p10)
}
  0x37   : > { %s1990_s4 = sld [smem:[#allocation25_spill]]  ;;  %s1624_s13 = smov [#allocation13]  }
  0x38   : > { %s283_s14 = sshll.u32 %s1624_s13, 4  ;;  %s284_s14 = int_to_ptr.vmem [resolvable:$true] %s283_s14 }
  0x39   : > { %s1450_s16 = scalar_lea.vmem %s284_s14, 256  ;;  %p1458_p0 = scmp.lt.s32.totalorder %s284_s14, %s284_s14 }
  0x3a   : > { %p1451_p11 = scmp.ne.s32.totalorder %s284_s14, %s1450_s16  ;;  %p1459_p2 = scmp.lt.s32.totalorder %s1450_s16, %s1450_s16 }
  0x3c   : > { %p1453_p12 = pnand %p1451_p11, %p1363_p7  ;;  %p1460_p4 = por %p1459_p2, %p1458_p0 }
  0x3d   : > { %1263 = dma.hbm_to_vmem [thread:$0]  (!%p1716_p6), %s1990_s4, 256, %s271_s15, [#allocation11], %s1622_s17, %s1622_s17, %s1623_s18  }
  0x3e   : > { %p1454_p13 = pneg %p1453_p12 }
  0x40   : > { %p1461_p8 = pnand %p1460_p4, %p1454_p13 }
  0x42   : > { %1464 = shalt.err (!%p1461_p8)
}
  0x43   : > { %s1991_s5 = sld [smem:[#allocation26_spill]]  ;;  %s1106_s11 = sadd.s32 4294967294, %s1617_s29  }
  0x44   : > { %s40_s20 = sadd.s32 1, %s1613_s28  ;;  %s49_s21 = sadd.s32 1, %s1605_s26 }
  0x45   : > { %p42_p7 = scmp.ge.s32.totalorder %s40_s20, 2  ;;  %p56_p9 = scmp.ne.s32.totalorder %s1605_s26, %s1601_s25 }
  0x46   : > { %p57_p10 = scmp.eq.s32.totalorder %s1617_s29, 0  ;;  %p62_p12 = scmp.ne.s32.totalorder %s1601_s25, %s1597_s24 }
  0x47   : > { %s2011_s20 = smov (%p42_p7, %s40_s20), 0  ;;  %p225_p4 = scmp.eq.s32.totalorder %s1106_s11, 1 }
  0x48   : > { %p1774_p11 = por %p57_p10, %p56_p9  ;;  %p1785_p0 = por %p1980_p1, %p62_p12 }
  0x49   : > { %1266 = dma.hbm_to_vmem [thread:$0]  (!%p1716_p6), %s1991_s5, 256, %s284_s14, [#allocation14], %s1622_s17, %s1622_s17, %s1623_s18  }
  0x4a   : > { %s44_s17 = ssub.s32 %s1613_s28, %s2011_s20  ;;  %p219_p6 = scmp.eq.s32.totalorder %s1702_s30, 1 }
  0x4b   : > { %p47_p13 = scmp.eq.s32.totalorder %s44_s17, 0  ;;  %p1796_p8 = por %p225_p4, %p62_p12 }
  0x4c   : > { %p1789_p2 = por %p219_p6, %p56_p9  ;;  %p1282_p7 = scmp.lt.s32.totalorder %s1617_s29, 2 }
  0x4d   : > { %s1794_s9 = scalar_select %p47_p13, %s1605_s26, %s49_s21  }
  0x4e   : > { %s300_s12 = sand.u32 1, %s1605_s26   ;;  %s1114_s13 = sshll.u32 %s1613_s28, 7 }
  0x4f   : > { %s1113_s14 = sshll.u32 %s300_s12, 3  ;;  %s1996_s0 = sld [smem:[#allocation22_spill]] }
  0x50   : > { %s304_s17 = scalar_lea.vmem [#allocation4], %s1113_s14  ;;  %p1808_p9 = pnand %p1282_p7, %p1774_p11 }
  0x51   : > { %s312_s2 = sshll.u32 %s304_s17, 4  ;;  %s1815_s4 = scalar_lea.hbm %s1973_s1, %s1114_s13  ;;  %s313_s2 = int_to_ptr.vmem [resolvable:$true] %s312_s2 }
  0x52   : > { %s301_s5 = scalar_lea.sflag [#allocation5], %s300_s12  ;;  %p1467_p10 = pneg %p1808_p9 }
  0x53   : > { %s1478_s16 = scalar_lea.vmem %s313_s2, 128  ;;  %s1625_s22 = smov [#allocation4]  }
  0x54   : > { %p1479_p12 = scmp.ne.s32.totalorder %s313_s2, %s1478_s16  ;;  %s1483_s15 = sshll.u32 %s1625_s22, 4  ;;  %s1484_s15 = int_to_ptr.vmem [resolvable:$false] %s1483_s15 }
  0x55   : > { %s310_s19 = scalar_lea.hbm %s1996_s0, %s1114_s13  ;;  %s1485_s17 = scalar_lea.vmem %s1484_s15, 256 }
  0x56   : > { %p1481_p6 = pnand %p1479_p12, %p1467_p10  ;;  %p1486_p13 = scmp.lt.s32.totalorder %s313_s2, %s1484_s15 }
  0x57   : > { %p1487_p4 = scmp.lt.s32.totalorder %s1485_s17, %s1478_s16 }
  0x58   : > { %p1482_p11 = pneg %p1481_p6 }
  0x59   : > { %p1488_p7 = por %p1487_p4, %p1486_p13 }
  0x5b   : > { %p1489_p5 = pnand %p1488_p7, %p1482_p11 }
  0x5d   : > { %1492 = shalt.err (!%p1489_p5)
}
  0x5e   : > { %1270 = dma.hbm_to_vmem [thread:$0]  (!%p1808_p9), %s310_s19, 128, %s313_s2, %s301_s5  }
  0x5f   : > { %s319_s12 = sand.u32 1, %s1617_s29   ;;  %s323_s13 = scalar_lea.vmem [#allocation7], %s1113_s14 }
  0x60   : > { %s330_s11 = sshll.u32 %s323_s13, 4  ;;  %s320_s21 = scalar_lea.sflag [#allocation8], %s319_s12  ;;  %s331_s11 = int_to_ptr.vmem [resolvable:$true] %s330_s11 }
  0x61   : > { %s1506_s0 = scalar_lea.vmem %s331_s11, 128  ;;  %s1626_s16 = smov [#allocation7]  }
  0x62   : > { %p1507_p12 = scmp.ne.s32.totalorder %s331_s11, %s1506_s0  ;;  %s1511_s22 = sshll.u32 %s1626_s16, 4  ;;  %s1512_s22 = int_to_ptr.vmem [resolvable:$false] %s1511_s22 }
  0x63   : > { %s1513_s15 = scalar_lea.vmem %s1512_s22, 256  ;;  %p1514_p5 = scmp.lt.s32.totalorder %s331_s11, %s1512_s22 }
  0x64   : > { %p1509_p6 = pnand %p1507_p12, %p1467_p10  ;;  %p1515_p11 = scmp.lt.s32.totalorder %s1513_s15, %s1506_s0 }
  0x66   : > { %p1510_p1 = pneg %p1509_p6  ;;  %p1516_p13 = por %p1515_p11, %p1514_p5 }
  0x68   : > { %p1517_p4 = pnand %p1516_p13, %p1510_p1 }
  0x6a   : > { %1520 = shalt.err (!%p1517_p4)
}
  0x6b   : > { %1273 = dma.hbm_to_vmem [thread:$0]  (!%p1808_p9), %s1815_s4, 128, %s331_s11, %s320_s21  }
  0x6c   : > { %339 = sbr.rel (%p1707_p3) target bundleno = 1375 (0x55f), region = 48  ;;  %s1834_s2 = sand.u32 (!%p1707_p3), 1, %s1601_s25  }
  0x6d   : > { %s1837_s5 = sshll.u32 (!%p1707_p3), %s1834_s2, 3  ;;  %s342_s0 = scalar_lea.sflag (!%p1707_p3), [#allocation5], %s1834_s2 }
  0x6e   : > { %s345_s14 = scalar_lea.vmem (!%p1707_p3), [#allocation4], %s1837_s5 }
  0x71   : > { %1572 = dma.done.wait (%p1785_p0), %s342_s0, 128  }
  0x72   : > { %1574 = vsyncadd (%p1785_p0), %s342_s0, 4294967168  ;;  %s350_s3 = sand.u32 1, %s1702_s30   ;;  %s354_s8 = scalar_lea.vmem [#allocation7], %s1837_s5 }
  0x73   : > { %s351_s4 = scalar_lea.sflag [#allocation8], %s350_s3 }
  0x74   : > { %1576 = dma.done.wait (%p1785_p0), %s351_s4, 128  }
  0x75   : > { %1578 = vsyncadd (%p1785_p0), %s351_s4, 4294967168  ;;  %p1998_p1 = scmp.eq.s32.totalorder %s1702_s30, 0 }
  0x77   : > { %1580 = dma.done.wait (%p1998_p1), [#allocation8], 256   ;;  %p1999_p3 = pmov %p1998_p1 }
  0x78   : > { %p2000_p9 = pmov %p1998_p1 }
  0x79   : > { %1582 = vsyncadd (%p1999_p3), [#allocation8], 4294967040 }
  0x7a   : > { %1584 = dma.done.wait (%p2000_p9), [#allocation11], 512   ;;  %p2001_p10 = pmov %p1998_p1 }
  0x7b   : > { %p2002_p7 = pmov %p1998_p1 }
  0x7c   : > { %1586 = vsyncadd (%p2001_p10), [#allocation11], 4294966784 }
  0x7d   : > { %1588 = dma.done.wait (%p2002_p7), [#allocation14], 256   ;;  %p2003_p12 = pmov %p1998_p1 }
  0x7e   : > { %v1627_v0 = vmov 0.0   ;;  %vm1628_vm0 = vmmov 0   ;;  %v1345_v1 = vld [vmem:[#allocation10 + $0x8] sm:$0xff]   ;;  %v1346_v2 = vld [vmem:[#allocation10] sm:$0xff]   ;;  %vm429_vm1 = vcmask 261120   ;;  %v1347_v4 = vld [vmem:[#allocation9 + $0x8] sm:$0xff]  }
  0x7f   : > { %1590 = vsyncadd (%p2003_p12), [#allocation14], 4294967040  ;;  %1172 = vmatprep.subr.bf16.mxu0 %v1627_v0  ;;  %1176 = vmatprep.mubr.msk.bf16.mxu0 %vm1628_vm0, %v1627_v0  ;;  %v411_v3 = vld [vmem:[%s354_s8] sm:$0xff]  ;;  %v1348_v6 = vld [vmem:[#allocation9] sm:$0xff]   ;;  %vm530_vm2 = vcmask 125952   ;;  %s1629_s30 = smov 112  }
  0x80   : > { %1180 = vmatprep.subr.bf16.mxu1 %v1627_v0  ;;  %1184 = vmatprep.mubr.msk.bf16.mxu1 %vm1628_vm0, %v1627_v0  ;;  %v412_v5 = vpack.c.bf16 %v411_v3, %v411_v3  ;;  %v550_v7 = vld [vmem:[%s345_s14] sm:$0xff]  ;;  %vm622_vm3 = vcmask 130048   ;;  %vm743_vm4 = vcmask 1043456   ;;  %vm715_vm5 = vcmask 64512   ;;  %v1351_v59 = vld [vmem:[#allocation13] sm:$0xff]   ;;  %v1352_v3 = vld [vmem:[#allocation13 + $0x8] sm:$0xff]  }
  0x81   : > { %1173 = vmatpush3.bf16.msra.mxu0 %v1345_v1  ;;  %v551_v8 = vpack.c.bf16 %v550_v7, %v550_v7  ;;  %v1349_v9 = vld [vmem:[#allocation12 + $0x8] sm:$0xff]   ;;  %v1350_v10 = vld [vmem:[#allocation12] sm:$0xff]   ;;  %s1146_s17 = sshll.u32 %s1609_s27, 7  ;;  %s405_s12 = scalar_lea.vmem [#allocation15], %s1837_s5 }
  0x82   : > { %1174 = vmatprep.subr.bf16.mxu0 %v1627_v0  ;;  %1181 = vmatpush3.bf16.msra.mxu1 %v1349_v9  ;;  %s964_s13 = sshll.u32 %s405_s12, 4  ;;  %s1929_s16 = scalar_lea.hbm %s1979_s7, %s1146_s17  ;;  %s965_s13 = int_to_ptr.vmem [resolvable:$true] %s964_s13 }
  0x83   : > { %1182 = vmatprep.subr.bf16.mxu1 %v1627_v0  ;;  %s950_s22 = scalar_lea.sflag [#allocation6], %s1834_s2  ;;  %s1521_s15 = scalar_lea.vmem %s965_s13, 128 }
  0x84   : > { %p1522_p0 = scmp.ne.s32.totalorder %s965_s13, %s1521_s15  ;;  %s1630_s27 = smov [#allocation15]  }
  0x85   : > { %1175 = vmatpush3.bf16.msra.mxu0 %v1346_v2  ;;  %s1525_s5 = sshll.u32 %s1630_s27, 4  ;;  %s1526_s5 = int_to_ptr.vmem [resolvable:$false] %s1525_s5 }
  0x86   : > { %1188 = vmatprep.subr.bf16.mxu0 %v1627_v0  ;;  %1183 = vmatpush3.bf16.msra.mxu1 %v1350_v10  ;;  %p1523_p6 = pnand %p1522_p0, %p1789_p2  ;;  %s1527_s0 = scalar_lea.vmem %s1526_s5, 256 }
  0x87   : > { %1196 = vmatprep.subr.bf16.mxu1 %v1627_v0  ;;  %p1528_p11 = scmp.lt.s32.totalorder %s965_s13, %s1526_s5  ;;  %p1529_p13 = scmp.lt.s32.totalorder %s1527_s0, %s1521_s15 }
  0x88   : > { %1177 = vmatmul.mubr.msk.bf16.vlgmr.msra.gmra.mxu0 %vm429_vm1, %v412_v5  ;;  %p1524_p5 = pneg %p1523_p6 }
  0x89   : > { %1189 = vmatpush3.bf16.msra.mxu0 %v1347_v4  ;;  %1192 = vmatprep.mubr.msk.bf16.mxu0 %vm1628_vm0, %v1627_v0  ;;  %p1530_p4 = por %p1529_p13, %p1528_p11 }
  0x8a   : > { %1190 = vmatprep.subr.bf16.mxu0 %v1627_v0  ;;  %1185 = vmatmul.mubr.msk.bf16.vlgmr.msra.gmra.mxu1 %vm429_vm1, %v412_v5 }
  0x8b   : > { %1198 = vmatprep.mubr.msk.bf16.mxu1 %vm1628_vm0, %v1627_v0  ;;  %p1531_p1 = pnand %p1530_p4, %p1524_p5 }
  0x8d   : > { %1191 = vmatpush3.bf16.msra.mxu0 %v1348_v6 }
  0x8e   : > { %1202 = vmatprep.subr.bf16.mxu0 %v1627_v0 }
  0x90   : > { %1193 = vmatmul.mubr.msk.bf16.vlgmr.msra.gmra.mxu0 %vm429_vm1, %v551_v8 }
  0x91   : > { %1204 = vmatprep.mubr.msk.bf16.mxu0 %vm1628_vm0, %v1627_v0 }
 0x148   : > { %v467_v11 = vpop.f32.mrf.mxu0 }
 0x149   : > { %v529_v12 = vpack.c.bf16 %v467_v11, %v467_v11 }
 0x14a   : > { %v1178_v13 = vpop.f32.mrf.mxu0  ;;  %v523_v23 = vpop.f32.mrf.mxu1 }
 0x14b   : > { %531 = vst.msk [vmem:[#allocation2] sm:$0xf] %vm530_vm2, %v529_v12  ;;  %537 = vrot.lane.b32.xlu0 %v529_v12, %s1629_s30  ;;  %v532_v24 = vpack.c.bf16 %v523_v23, %v523_v23 }
 0x14c   : > { %v470_v14 = vpop.f32.mrf.mxu0  ;;  %v1186_v25 = vpop.f32.mrf.mxu1 }
 0x14d   : > { %533 = vst.msk [vmem:[#allocation3] sm:$0xf] %vm530_vm2, %v532_v24 }
 0x14e   : > { %v1179_v15 = vpop.f32.mrf.mxu0  ;;  %v526_v26 = vpop.f32.mrf.mxu1 }
 0x150   : > { %v606_v16 = vpop.f32.mrf.mxu0  ;;  %v1187_v27 = vpop.f32.mrf.mxu1 }
 0x151   : > { %613 = vrot.lane.b32.xlu0 %v606_v16, %s1629_s30  ;;  %v616_v22 = vpack.c.bf16 %v606_v16, %v606_v16 }
 0x152   : > { %v1194_v17 = vpop.f32.mrf.mxu0  ;;  %v618_v18 = vld [vmem:[#allocation2] sm:$0xf] }
 0x153   : > { %v627_v19 = vsel %vm622_vm3, %v618_v18, 0 }
 0x154   : > { %1197 = vmatpush3.bf16.xpose.msra.mxu1 %v627_v19  ;;  %v609_v20 = vpop.f32.mrf.mxu0  ;;  %v620_v33 = vld [vmem:[#allocation3] sm:$0xf] }
 0x155   : > { %1208 = vmatprep.subr.bf16.mxu1 %v1627_v0  ;;  %v745_v34 = vsel %vm743_vm4, %v620_v33, 0 }
 0x156   : > { %v1195_v21 = vpop.f32.mrf.mxu0 }
 0x157   : > { %v1144_v21 = vld [vmem:[%s1978_s6] ss:$0 sm:$0xff] }
 0x15b   : > { %1199 = vmatmul.mubr.msk.bf16.vlgmr.msra.gmra.mxu1 %vm622_vm3, %v616_v22 }
 0x15c   : > { %1210 = vmatprep.mubr.msk.bf16.mxu1 %vm1628_vm0, %v1627_v0  ;;  %1209 = vmatpush3.bf16.msra.mxu1 %v745_v34 }
 0x15d   : > { %1220 = vmatprep.subr.bf16.mxu1 %v1627_v0 }
 0x1bd   : > { %v538_v28 = vpop.permute.xlu0 %537 }
 0x1be   : > { %541 = vst.msk [vmem:[#allocation2 + $0x4] sm:$0xf] %vm530_vm2, %v538_v28 }
 0x1c3   : > { %v614_v31 = vpop.permute.xlu0 %613 }
 0x1c4   : > { %v617_v32 = vpack.c.bf16 %v614_v31, %v614_v31 }
 0x1c5   : > { %v619_v29 = vld [vmem:[#allocation2 + $0x4] sm:$0xf] }
 0x1c6   : > { %v673_v30 = vsel %vm622_vm3, %v619_v29, 0 }
 0x1c7   : > { %1203 = vmatpush3.bf16.xpose.msra.mxu0 %v673_v30 }
 0x1c8   : > { %1214 = vmatprep.subr.bf16.mxu0 %v1627_v0 }
 0x1ce   : > { %1205 = vmatmul.mubr.msk.bf16.vlgmr.msra.gmra.mxu0 %vm622_vm3, %v617_v32 }
 0x1cf   : > { %1216 = vmatprep.mubr.msk.bf16.mxu0 %vm1628_vm0, %v1627_v0 }
 0x21b   : > { %v663_v35 = vpop.f32.mrf.mxu1 }
 0x21c   : > { %v716_v36 = vsel %vm715_vm5, %v663_v35, -inf }
 0x21d   : > { %717 = vmax.xlane.f32.xlu1 %v716_v36  ;;  %v1200_v37 = vpop.f32.mrf.mxu1 }
 0x21f   : > { %v666_v38 = vpop.f32.mrf.mxu1 }
 0x221   : > { %v1201_v39 = vpop.f32.mrf.mxu1 }
 0x28e   : > { %v709_v40 = vpop.f32.mrf.mxu0 }
 0x28f   : > { %v719_v41 = vsel %vm715_vm5, %v709_v40, -inf }
 0x290   : > { %720 = vmax.xlane.f32.xlu1 %v719_v41  ;;  %v1206_v42 = vpop.f32.mrf.mxu0 }
 0x292   : > { %v712_v43 = vpop.f32.mrf.mxu0 }
 0x294   : > { %v1207_v44 = vpop.f32.mrf.mxu0 }
 0x2a6   : > { %v718_v45 = vpop.xlane.xlu1 %717 }
 0x2a7   : > { %v722_v46 = vsub.f32 %v663_v35, %v718_v45 }
 0x2a9   : > { %v724_v47 = vmul.f32 1.442695, %v722_v46 }
 0x2ab   : > { %1353 = vpow2.f32 %v724_v47 }
 0x2b8   : > { %v1354_v48 = vpop.eup %1353 }
 0x2b9   : > { %v728_v49 = vsel %vm715_vm5, %v1354_v48, 0.0 }
 0x2ba   : > { %729 = vadd.xlane.f32.xlu0 %v728_v49 }
 0x319   : > { %v721_v50 = vpop.xlane.xlu1 %720 }
 0x31a   : > { %v723_v51 = vsub.f32 %v709_v40, %v721_v50 }
 0x31c   : > { %v726_v52 = vmul.f32 1.442695, %v723_v51 }
 0x31e   : > { %1355 = vpow2.f32 %v726_v52 }
 0x32b   : > { %v1356_v53 = vpop.eup %1355 }
 0x32c   : > { %v731_v54 = vsel %vm715_vm5, %v1356_v53, 0.0 }
 0x32d   : > { %732 = vadd.xlane.f32.xlu1 %v731_v54 }
 0x33e   : > { %545 = vrot.lane.b32.xlu1 %v532_v24, %s1629_s30 }
 0x343   : > { %v730_v55 = vpop.xlane.xlu0 %729 }
 0x344   : > { %1357 = vrcp.f32 %v730_v55 }
 0x351   : > { %v1358_v56 = vpop.eup %1357 }
 0x352   : > { %v736_v57 = vmul.f32 %v1358_v56, %v1354_v48 }
 0x354   : > { %v738_v58 = vpack.c.bf16 %v736_v57, %v736_v57 }
 0x356   : > { %1211 = vmatmul.mubr.msk.bf16.vlgmr.msra.gmra.mxu1 %vm715_vm5, %v738_v58 }
 0x357   : > { %1222 = vmatprep.mubr.msk.bf16.mxu1 %vm1628_vm0, %v1627_v0  ;;  %1221 = vmatpush3.bf16.msra.mxu1 %v1351_v59 }
 0x3b6   : > { %v733_v60 = vpop.xlane.xlu1 %732 }
 0x3b7   : > { %1359 = vrcp.f32 %v733_v60 }
 0x3ba   : > { %v546_v61 = vpop.permute.xlu1 %545 }
 0x3bb   : > { %549 = vst.msk [vmem:[#allocation3 + $0x4] sm:$0xf] %vm530_vm2, %v546_v61 }
 0x3c2   : > { %v621_v62 = vld [vmem:[#allocation3 + $0x4] sm:$0xf] }
 0x3c3   : > { %v791_v63 = vsel %vm743_vm4, %v621_v62, 0 }
 0x3c4   : > { %v1360_v1 = vpop.eup %1359  ;;  %1215 = vmatpush3.bf16.msra.mxu0 %v791_v63 }
 0x3c5   : > { %v737_v2 = vmul.f32 %v1360_v1, %v1356_v53  ;;  %1226 = vmatprep.subr.bf16.mxu0 %v1627_v0 }
 0x3c7   : > { %v739_v4 = vpack.c.bf16 %v737_v2, %v737_v2 }
 0x3c9   : > { %1217 = vmatmul.mubr.msk.bf16.vlgmr.msra.gmra.mxu0 %vm715_vm5, %v739_v4 }
 0x3ca   : > { %1227 = vmatpush3.bf16.msra.mxu0 %v1352_v3  ;;  %1228 = vmatprep.mubr.msk.bf16.mxu0 %vm1628_vm0, %v1627_v0 }
 0x416   : > { %v781_v5 = vpop.f32.mrf.mxu1 }
 0x417   : > { %v833_v6 = vpack.c.bf16 %v781_v5, %v781_v5 }
 0x418   : > { %v1212_v7 = vpop.f32.mrf.mxu1 }
 0x419   : > { %1223 = vmatmul.mubr.msk.bf16.vlgmr.msra.gmra.mxu1 %vm622_vm3, %v833_v6 }
 0x41a   : > { %v784_v8 = vpop.f32.mrf.mxu1 }
 0x41c   : > { %v1213_v9 = vpop.f32.mrf.mxu1 }
 0x489   : > { %v827_v10 = vpop.f32.mrf.mxu0 }
 0x48a   : > { %v834_v11 = vpack.c.bf16 %v827_v10, %v827_v10 }
 0x48b   : > { %v1218_v12 = vpop.f32.mrf.mxu0 }
 0x48c   : > { %1229 = vmatmul.mubr.msk.bf16.vlgmr.msra.gmra.mxu0 %vm622_vm3, %v834_v11 }
 0x48d   : > { %v830_v13 = vpop.f32.mrf.mxu0 }
 0x48f   : > { %v1219_v14 = vpop.f32.mrf.mxu0 }
 0x4d9   : > { %v882_v15 = vpop.f32.mrf.mxu1 }
 0x4da   : > { %v937_v19 = vsel %vm429_vm1, %v882_v15, 0.0 }
 0x4db   : > { %v1224_v16 = vpop.f32.mrf.mxu1 }
 0x4dd   : > { %v885_v17 = vpop.f32.mrf.mxu1 }
 0x4df   : > { %v1225_v0 = vpop.f32.mrf.mxu1 }
 0x54c   : > { %v931_v18 = vpop.f32.mrf.mxu0 }
 0x54d   : > { %v938_v20 = vsel %vm429_vm1, %v931_v18, 0.0 }
 0x54e   : > { %v939_v22 = vadd.f32 %v938_v20, %v937_v19  ;;  %v1230_v23 = vpop.f32.mrf.mxu0 }
 0x550   : > { %v947_v24 = vadd.f32 %v1144_v21, %v939_v22  ;;  %v934_v25 = vpop.f32.mrf.mxu0 }
 0x552   : > { %v1231_v26 = vpop.f32.mrf.mxu0  ;;  %948 = vst.msk [vmem:[%s405_s12] sm:$0xff] %vm429_vm1, %v947_v24 }
 0x553   : > { %1534 = shalt.err (!%p1531_p1)
}
 0x554   : > { %s1535_s14 = scalar_lea.hbm %s1929_s16, 128  ;;  %s1539_s4 = scalar_lea.hbm %s1979_s7, 256 }
 0x555   : > { %p1536_p3 = scmp.ne.s32.totalorder %s1929_s16, %s1535_s14  ;;  %p1540_p7 = scmp.lt.s32.totalorder %s1929_s16, %s1979_s7 }
 0x556   : > { %p1541_p12 = scmp.lt.s32.totalorder %s1539_s4, %s1535_s14 }
 0x557   : > { %p1537_p9 = pnand %p1536_p3, %p1789_p2 }
 0x558   : > { %p1542_p0 = por %p1541_p12, %p1540_p7 }
 0x559   : > { %p1538_p10 = pneg %p1537_p9 }
 0x55b   : > { %p1543_p6 = pnand %p1542_p0, %p1538_p10 }
 0x55d   : > { %1546 = shalt.err (!%p1543_p6)
}
 0x55e   : > { %1252 = dma.vmem_to_hbm [thread:$0]  (%p1789_p2), %s965_s13, 128, %s1929_s16, %s950_s22  }
 0x55f PF: > { %s976_s18 = sand.u32 1, %s1597_s24   ;;  %p2004_p5 = scmp.ge.s32.totalorder %s1617_s29, 2 }
 0x560   : > { %s977_s19 = scalar_lea.sflag [#allocation6], %s976_s18 }
 0x561   : > { %p1275_p11 = pnand %p2004_p5, %p1796_p8 }
 0x563   : > { %p1276_p13 = pneg %p1275_p11 }
 0x565   : > { %1592 = dma.done.wait (%p1276_p13), %s977_s19, 128  }
 0x566   : > { %1594 = vsyncadd (%p1276_p13), %s977_s19, 4294967168  ;;  %s28_s29 = sadd.s32 1, %s1617_s29   ;;  %s2005_s24 = smov %s1601_s25 }
 0x567   : > { %p25_p4 = scmp.ge.s32.totalorder %s28_s29, 4   ;;  %s2006_s25 = smov %s1605_s26 }
 0x568   : > { %s2007_s26 = smov %s1794_s9  ;;  %s2008_s27 = smov %s1613_s28 }
 0x569   : > { %s2009_s28 = smov %s2011_s20  ;;  %27 = sbr.rel (!%p25_p4) target bundleno = 16 (0x10), region = 128 }
 0x56e   :  { %982 = vsyncpa [#allocation5], 1 }
 0x56f   :  { %984 = vsyncpa [#allocation5 + $0x1], 1 }
 0x570   :  { %985 = vsyncpa [#allocation8], 1 }
 0x571   :  { %987 = vsyncpa [#allocation8 + $0x1], 1 }
 0x572   :  { %988 = vsyncpa [#allocation11], 1 }
 0x573   :  { %989 = vsyncpa [#allocation14], 1 }
 0x574   :  { %990 = vsyncpa [#allocation6], 1 }
 0x575   :  { %992 = vsyncpa [#allocation6 + $0x1], 1 }

</bundles_post_ra>
